<compile_context>
chip_gen: v6e
topology: v6e:2x2x1
jax: 0.10.0
libtpu: 0.0.40
codegen_flags: <defaults>
</compile_context>

<pallas_src>
import jax
import jax.numpy as jnp
from jax import lax
from jax.experimental import pallas as pl
from jax.experimental.pallas import tpu as pltpu


# ---------------------------------------------------------------------------
# Model hyper-parameters (small, consistent with the module's __init__)
# ---------------------------------------------------------------------------
TRANSFORMER_DIM = 32      # transformer_model.config.hidden_size
HIDDEN_SIZE = 32          # hidden_size
NUM_RULES = 16            # len(rules) + 1
MAX_NUM_CHILDREN = 10
CHILD_NUM_EMB_SIZE = 8
BATCH = 8

CAT_DIM = 2 * TRANSFORMER_DIM + CHILD_NUM_EMB_SIZE   # 72
LN_EPS = 1e-5
MAX_TILE_B = 256          # row-tile size once many solver calls are stacked


def _gelu_exact(x):
    # PyTorch F.gelu default: exact erf-based gelu.
    return 0.5 * x * (1.0 + lax.erf(x * 0.7071067811865476))


def _layer_norm(x, gamma, beta):
    mean = jnp.mean(x, axis=-1, keepdims=True)
    var = jnp.mean(jnp.square(x - mean), axis=-1, keepdims=True)
    inv = lax.rsqrt(var + LN_EPS)
    return (x - mean) * inv * gamma + beta


# ---------------------------------------------------------------------------
# Pallas kernel: fused gather + MLP + LayerNorm + logits + mask
# ---------------------------------------------------------------------------
def solver_kernel(q_ref, pidx_ref, cidx_ref, mask_ref,
                  w1q_ref, rw1p_ref, cw1c_ref, w2_ref, vecs_ref, yT_ref,
                  out_ref):
    q = q_ref[...]                                   # [TB, D]
    tb = q.shape[0]

    b1 = vecs_ref[0:1, :]                            # [1, H]
    b2 = vecs_ref[1:2, :]
    gamma = vecs_ref[2:3, :]
    beta = vecs_ref[3:4, :]

    # Fused embedding gathers: one-hot(index) @ pre-projected embedding table.
    p_oh = (pidx_ref[...] ==
            lax.broadcasted_iota(jnp.int32, (tb, NUM_RULES), 1)).astype(jnp.float32)
    c_oh = (cidx_ref[...] ==
            lax.broadcasted_iota(jnp.int32, (tb, MAX_NUM_CHILDREN), 1)).astype(jnp.float32)

    # linear1 on the (virtual) concat [q | rule_emb[parent] | child_emb[child]].
    # NOTE: self.dropout is identity in eval mode -> omitted.
    h = (jnp.dot(q, w1q_ref[...], preferred_element_type=jnp.float32)
         + jnp.dot(p_oh, rw1p_ref[...], preferred_element_type=jnp.float32)
         + jnp.dot(c_oh, cw1c_ref[...], preferred_element_type=jnp.float32)
         + b1)
    h = _gelu_exact(h)
    h = _layer_norm(h, gamma, beta)   # single shared self.layer_norm applied twice

    h = jnp.dot(h, w2_ref[...], preferred_element_type=jnp.float32) + b2
    h = _gelu_exact(h)
    h = _layer_norm(h, gamma, beta)                  # [TB, H]

    # preds = h @ (output_proj(rule_embeddings.weight)).T  (yT precomputed)
    preds = jnp.dot(h, yT_ref[...], preferred_element_type=jnp.float32)   # [TB, R]

    m = mask_ref[...]
    out_ref[...] = jnp.where(m != 0.0, preds, -1e18)  # binary softmax mask fill


# ---------------------------------------------------------------------------
# Batch-independent precompute (hoisted out of the per-call hot path)
# ---------------------------------------------------------------------------
def prepare_params(params):
    """Re-run whenever rule_emb / w1 / wop / bop change (static in eval)."""
    D = TRANSFORMER_DIM
    w1 = params["w1"]                                            # [CAT_DIM, H]
    return dict(
        w1q=w1[:D, :],                                           # [D, H]
        rule_w1p=params["rule_emb"] @ w1[D:2 * D, :],            # [R, H]
        child_w1c=params["child_emb"] @ w1[2 * D:, :],           # [MC, H]
        w2=params["w2"],                                         # [H, H]
        vecs=jnp.concatenate([params["b1"], params["b2"],
                              params["ln_gamma"], params["ln_beta"]],
                             axis=0),                            # [4, H]
        yT=(params["rule_emb"] @ params["wop"] + params["bop"]).T,   # [H, R]
    )


# ---------------------------------------------------------------------------
# Forward wrapper (predictions-only path: labels=None, question_emb provided)
# ---------------------------------------------------------------------------
def transformer_solver_forward(q_emb, parent_inds, child_nums, softmax_masks, prep):
    B = q_emb.shape[0]
    D, H, R, C = TRANSFORMER_DIM, HIDDEN_SIZE, NUM_RULES, MAX_NUM_CHILDREN

    # Row tiling: one block for small B, 256-row tiles for big stacked batches.
    if B <= MAX_TILE_B:
        tile_b, b_pad = B, B
    else:
        tile_b = MAX_TILE_B
        b_pad = pl.cdiv(B, tile_b) * tile_b

    q = q_emb.astype(jnp.float32)
    p_idx = parent_inds.astype(jnp.int32).reshape(B, 1)
    c_idx = child_nums.astype(jnp.int32).reshape(B, 1)
    masks = softmax_masks.astype(jnp.float32)
    if b_pad != B:
        pad = b_pad - B
        q = jnp.pad(q, ((0, pad), (0, 0)))
        p_idx = jnp.pad(p_idx, ((0, pad), (0, 0)))
        c_idx = jnp.pad(c_idx, ((0, pad), (0, 0)))
        masks = jnp.pad(masks, ((0, pad), (0, 0)))

    row = lambda cols: pl.BlockSpec((tile_b, cols), lambda i: (i, 0))
    rep = lambda r, c: pl.BlockSpec((r, c), lambda i: (0, 0))   # resident weights

    out = pl.pallas_call(
        solver_kernel,
        out_shape=jax.ShapeDtypeStruct((b_pad, R), jnp.float32),
        grid=(b_pad // tile_b,),
        in_specs=[
            row(D),        # q_emb
            row(1),        # parent_inds
            row(1),        # child_nums
            row(R),        # softmax_masks
            rep(D, H),     # W1q
            rep(R, H),     # rule_emb @ W1p
            rep(C, H),     # child_emb @ W1c
            rep(H, H),     # W2
            rep(4, H),     # [b1; b2; ln_gamma; ln_beta]
            rep(H, R),     # yT = (output_proj(rule_emb)).T
        ],
        out_specs=row(R),
        compiler_params=pltpu.CompilerParams(
            dimension_semantics=("parallel",)),
    )(q, p_idx, c_idx, masks,
      prep["w1q"], prep["rule_w1p"], prep["child_w1c"],
      prep["w2"], prep["vecs"], prep["yT"])

    return out[:B] if b_pad != B else out


# ---------------------------------------------------------------------------
# Deterministic parameter init (torch-layout weights, stored pre-transposed)
# ---------------------------------------------------------------------------
def init_params(key):
    ks = jax.random.split(key, 8)
    f32 = jnp.float32
    return dict(
        rule_emb=jax.random.normal(ks[0], (NUM_RULES, TRANSFORMER_DIM), f32) * 0.02,
        child_emb=jax.random.normal(ks[1], (MAX_NUM_CHILDREN, CHILD_NUM_EMB_SIZE), f32) * 0.02,
        # linear1: torch weight [H, 2D+C] -> stored transposed [2D+C, H]
        w1=jax.random.normal(ks[2], (CAT_DIM, HIDDEN_SIZE), f32) * 0.05,
        b1=jax.random.normal(ks[3], (1, HIDDEN_SIZE), f32) * 0.01,
        w2=jax.random.normal(ks[4], (HIDDEN_SIZE, HIDDEN_SIZE), f32) * 0.05,
        b2=jax.random.normal(ks[5], (1, HIDDEN_SIZE), f32) * 0.01,
        ln_gamma=jnp.ones((1, HIDDEN_SIZE), f32),
        ln_beta=jnp.zeros((1, HIDDEN_SIZE), f32),
        # output_proj: torch weight [H, D] -> stored transposed [D, H]
        wop=jax.random.normal(ks[6], (TRANSFORMER_DIM, HIDDEN_SIZE), f32) * 0.05,
        bop=jax.random.normal(ks[7], (1, HIDDEN_SIZE), f32) * 0.01,
    )


# Pure-JAX reference mirroring the PyTorch forward (labels=None, eval mode).
def reference_forward(q_emb, parent_inds, child_nums, softmax_masks, params):
    p_emb = jnp.take(params["rule_emb"], parent_inds, axis=0)
    c_emb = jnp.take(params["child_emb"], child_nums, axis=0)
    x = jnp.concatenate([q_emb, p_emb, c_emb], axis=-1)
    x = _gelu_exact(x @ params["w1"] + params["b1"])
    x = _layer_norm(x, params["ln_gamma"], params["ln_beta"])
    x = _gelu_exact(x @ params["w2"] + params["b2"])
    x = _layer_norm(x, params["ln_gamma"], params["ln_beta"])
    y = params["rule_emb"] @ params["wop"] + params["bop"]
    preds = x @ y.T
    m = softmax_masks
    return preds * m - 1e18 * (1.0 - m)


if __name__ == "__main__":
    key = jax.random.PRNGKey(0)
    k_par, k_q, k_pi, k_cn, k_m = jax.random.split(key, 5)

    params = init_params(k_par)
    prep = prepare_params(params)

    q_emb = jax.random.normal(k_q, (BATCH, TRANSFORMER_DIM), jnp.float32)
    parent_inds = jax.random.randint(k_pi, (BATCH,), 0, NUM_RULES, jnp.int32)
    child_nums = jax.random.randint(k_cn, (BATCH,), 0, MAX_NUM_CHILDREN, jnp.int32)
    softmax_masks = jax.random.bernoulli(k_m, 0.7, (BATCH, NUM_RULES)).astype(jnp.float32)

    preds = transformer_solver_forward(q_emb, parent_inds, child_nums, softmax_masks, prep)
    preds = jax.block_until_ready(preds)
    assert preds.shape == (BATCH, NUM_RULES)

    ref = reference_forward(q_emb, parent_inds, child_nums, softmax_masks, params)
    assert jnp.allclose(preds, ref, rtol=2e-3, atol=2e-3), \
        float(jnp.max(jnp.abs(preds - ref)))

    # TODO(synk): optional CrossEntropyLoss (labels path) not implemented in-kernel;
    # predictions-only forward (labels=None, question_emb provided) is reproduced.
    print("KERNEL_OK")
</pallas_src>

<mosaic_0001>
module attributes {stable_mosaic.version = 11 : i64} {
  func.func @solver_kernel(%arg0: i32, %arg1: memref<8x32xf32, #tpu.memory_space<vmem>>, %arg2: memref<8x1xi32, #tpu.memory_space<vmem>>, %arg3: memref<8x1xi32, #tpu.memory_space<vmem>>, %arg4: memref<8x16xf32, #tpu.memory_space<vmem>>, %arg5: memref<32x32xf32, #tpu.memory_space<vmem>>, %arg6: memref<16x32xf32, #tpu.memory_space<vmem>>, %arg7: memref<10x32xf32, #tpu.memory_space<vmem>>, %arg8: memref<32x32xf32, #tpu.memory_space<vmem>>, %arg9: memref<4x32xf32, #tpu.memory_space<vmem>>, %arg10: memref<32x16xf32, #tpu.memory_space<vmem>>, %arg11: memref<8x16xf32, #tpu.memory_space<vmem>>) attributes {dimension_semantics = [#tpu.dimension_semantics<parallel>], iteration_bounds = array<i64: 1>, scalar_prefetch = 0 : i64, scratch_operands = 0 : i64, tpu.core_type = #tpu.core_type<tc>, window_params = [{transform_indices = @transform_0, window_bounds = array<i64: 8, 32>}, {transform_indices = @transform_1, window_bounds = array<i64: 8, 1>}, {transform_indices = @transform_2, window_bounds = array<i64: 8, 1>}, {transform_indices = @transform_3, window_bounds = array<i64: 8, 16>}, {pipeline_mode = #tpu.pipeline_mode<synchronous>, transform_indices = @transform_4, window_bounds = array<i64: 32, 32>}, {pipeline_mode = #tpu.pipeline_mode<synchronous>, transform_indices = @transform_5, window_bounds = array<i64: 16, 32>}, {pipeline_mode = #tpu.pipeline_mode<synchronous>, transform_indices = @transform_6, window_bounds = array<i64: 10, 32>}, {pipeline_mode = #tpu.pipeline_mode<synchronous>, transform_indices = @transform_7, window_bounds = array<i64: 32, 32>}, {pipeline_mode = #tpu.pipeline_mode<synchronous>, transform_indices = @transform_8, window_bounds = array<i64: 4, 32>}, {pipeline_mode = #tpu.pipeline_mode<synchronous>, transform_indices = @transform_9, window_bounds = array<i64: 32, 16>}, {transform_indices = @transform_10, window_bounds = array<i64: 8, 16>}]} {
    %c0 = arith.constant 0 : index
    %c0_0 = arith.constant 0 : index
    %0 = vector.load %arg1[%c0, %c0_0] : memref<8x32xf32, #tpu.memory_space<vmem>>, vector<8x32xf32>
    %c0_1 = arith.constant 0 : index
    %c0_2 = arith.constant 0 : index
    %1 = vector.load %arg9[%c0_1, %c0_2] : memref<4x32xf32, #tpu.memory_space<vmem>>, vector<1x32xf32>
    %c1 = arith.constant 1 : index
    %c0_3 = arith.constant 0 : index
    %2 = vector.load %arg9[%c1, %c0_3] : memref<4x32xf32, #tpu.memory_space<vmem>>, vector<1x32xf32>
    %c2 = arith.constant 2 : index
    %c0_4 = arith.constant 0 : index
    %3 = vector.load %arg9[%c2, %c0_4] : memref<4x32xf32, #tpu.memory_space<vmem>>, vector<1x32xf32>
    %c3 = arith.constant 3 : index
    %c0_5 = arith.constant 0 : index
    %4 = vector.load %arg9[%c3, %c0_5] : memref<4x32xf32, #tpu.memory_space<vmem>>, vector<1x32xf32>
    %c0_6 = arith.constant 0 : index
    %c0_7 = arith.constant 0 : index
    %5 = vector.load %arg2[%c0_6, %c0_7] : memref<8x1xi32, #tpu.memory_space<vmem>>, vector<8x1xi32>
    %6 = tpu.iota {dimensions = array<i32: 1>} : vector<8x16xi32>
    %7 = vector.broadcast %5 : vector<8x1xi32> to vector<8x16xi32>
    %8 = arith.cmpi eq, %7, %6 : vector<8x16xi32>
    %9 = arith.extui %8 : vector<8x16xi1> to vector<8x16xi32>
    %10 = arith.sitofp %9 : vector<8x16xi32> to vector<8x16xf32>
    %c0_8 = arith.constant 0 : index
    %c0_9 = arith.constant 0 : index
    %11 = vector.load %arg3[%c0_8, %c0_9] : memref<8x1xi32, #tpu.memory_space<vmem>>, vector<8x1xi32>
    %12 = tpu.iota {dimensions = array<i32: 1>} : vector<8x10xi32>
    %13 = vector.broadcast %11 : vector<8x1xi32> to vector<8x10xi32>
    %14 = arith.cmpi eq, %13, %12 : vector<8x10xi32>
    %15 = arith.extui %14 : vector<8x10xi1> to vector<8x10xi32>
    %16 = arith.sitofp %15 : vector<8x10xi32> to vector<8x10xf32>
    %c0_10 = arith.constant 0 : index
    %c0_11 = arith.constant 0 : index
    %17 = vector.load %arg5[%c0_10, %c0_11] : memref<32x32xf32, #tpu.memory_space<vmem>>, vector<32x32xf32>
    %cst = arith.constant dense<0.000000e+00> : vector<8x32xf32>
    %18 = tpu.matmul %0, %17, %cst {dimension_numbers = #tpu.dot_dimension_numbers<[1], [0], [0], [1], [0, 0, 1, 1], [], []>} : vector<8x32xf32>, vector<32x32xf32>, vector<8x32xf32> -> vector<8x32xf32>
    %c0_12 = arith.constant 0 : index
    %c0_13 = arith.constant 0 : index
    %19 = vector.load %arg6[%c0_12, %c0_13] : memref<16x32xf32, #tpu.memory_space<vmem>>, vector<16x32xf32>
    %cst_14 = arith.constant dense<0.000000e+00> : vector<8x32xf32>
    %20 = tpu.matmul %10, %19, %cst_14 {dimension_numbers = #tpu.dot_dimension_numbers<[1], [0], [0], [1], [0, 0, 1, 1], [], []>} : vector<8x16xf32>, vector<16x32xf32>, vector<8x32xf32> -> vector<8x32xf32>
    %21 = arith.addf %18, %20 : vector<8x32xf32>
    %c0_15 = arith.constant 0 : index
    %c0_16 = arith.constant 0 : index
    %22 = vector.load %arg7[%c0_15, %c0_16] : memref<10x32xf32, #tpu.memory_space<vmem>>, vector<10x32xf32>
    %cst_17 = arith.constant dense<0.000000e+00> : vector<8x32xf32>
    %23 = tpu.matmul %16, %22, %cst_17 {dimension_numbers = #tpu.dot_dimension_numbers<[1], [0], [0], [1], [0, 0, 1, 1], [], []>} : vector<8x10xf32>, vector<10x32xf32>, vector<8x32xf32> -> vector<8x32xf32>
    %24 = arith.addf %21, %23 : vector<8x32xf32>
    %25 = vector.broadcast %1 : vector<1x32xf32> to vector<8x32xf32>
    %26 = arith.addf %24, %25 : vector<8x32xf32>
    %cst_18 = arith.constant 5.000000e-01 : f32
    %27 = vector.broadcast %cst_18 : f32 to vector<8x32xf32>
    %28 = arith.mulf %27, %26 : vector<8x32xf32>
    %cst_19 = arith.constant 0.707106769 : f32
    %29 = vector.broadcast %cst_19 : f32 to vector<8x32xf32>
    %30 = arith.mulf %26, %29 : vector<8x32xf32>
    %31 = math.erf %30 : vector<8x32xf32>
    %cst_20 = arith.constant 1.000000e+00 : f32
    %32 = vector.broadcast %cst_20 : f32 to vector<8x32xf32>
    %33 = arith.addf %32, %31 : vector<8x32xf32>
    %34 = arith.mulf %28, %33 : vector<8x32xf32>
    %cst_21 = arith.constant dense<0.000000e+00> : vector<8xf32>
    %35 = vector.multi_reduction <add>, %34, %cst_21 [1] : vector<8x32xf32> to vector<8xf32>
    %36 = vector.shape_cast %35 : vector<8xf32> to vector<8x1xf32>
    %cst_22 = arith.constant 3.200000e+01 : f32
    %37 = vector.broadcast %cst_22 : f32 to vector<8x1xf32>
    %38 = arith.divf %36, %37 : vector<8x1xf32>
    %39 = vector.broadcast %38 : vector<8x1xf32> to vector<8x32xf32>
    %40 = arith.subf %34, %39 : vector<8x32xf32>
    %41 = arith.mulf %40, %40 : vector<8x32xf32>
    %cst_23 = arith.constant dense<0.000000e+00> : vector<8xf32>
    %42 = vector.multi_reduction <add>, %41, %cst_23 [1] : vector<8x32xf32> to vector<8xf32>
    %43 = vector.shape_cast %42 : vector<8xf32> to vector<8x1xf32>
    %cst_24 = arith.constant 3.200000e+01 : f32
    %44 = vector.broadcast %cst_24 : f32 to vector<8x1xf32>
    %45 = arith.divf %43, %44 : vector<8x1xf32>
    %cst_25 = arith.constant 9.99999974E-6 : f32
    %46 = vector.broadcast %cst_25 : f32 to vector<8x1xf32>
    %47 = arith.addf %45, %46 : vector<8x1xf32>
    %48 = math.rsqrt %47 : vector<8x1xf32>
    %49 = vector.broadcast %38 : vector<8x1xf32> to vector<8x32xf32>
    %50 = arith.subf %34, %49 : vector<8x32xf32>
    %51 = vector.broadcast %48 : vector<8x1xf32> to vector<8x32xf32>
    %52 = arith.mulf %50, %51 : vector<8x32xf32>
    %53 = vector.broadcast %3 : vector<1x32xf32> to vector<8x32xf32>
    %54 = arith.mulf %52, %53 : vector<8x32xf32>
    %55 = vector.broadcast %4 : vector<1x32xf32> to vector<8x32xf32>
    %56 = arith.addf %54, %55 : vector<8x32xf32>
    %c0_26 = arith.constant 0 : index
    %c0_27 = arith.constant 0 : index
    %57 = vector.load %arg8[%c0_26, %c0_27] : memref<32x32xf32, #tpu.memory_space<vmem>>, vector<32x32xf32>
    %cst_28 = arith.constant dense<0.000000e+00> : vector<8x32xf32>
    %58 = tpu.matmul %56, %57, %cst_28 {dimension_numbers = #tpu.dot_dimension_numbers<[1], [0], [0], [1], [0, 0, 1, 1], [], []>} : vector<8x32xf32>, vector<32x32xf32>, vector<8x32xf32> -> vector<8x32xf32>
    %59 = vector.broadcast %2 : vector<1x32xf32> to vector<8x32xf32>
    %60 = arith.addf %58, %59 : vector<8x32xf32>
    %cst_29 = arith.constant 5.000000e-01 : f32
    %61 = vector.broadcast %cst_29 : f32 to vector<8x32xf32>
    %62 = arith.mulf %61, %60 : vector<8x32xf32>
    %cst_30 = arith.constant 0.707106769 : f32
    %63 = vector.broadcast %cst_30 : f32 to vector<8x32xf32>
    %64 = arith.mulf %60, %63 : vector<8x32xf32>
    %65 = math.erf %64 : vector<8x32xf32>
    %cst_31 = arith.constant 1.000000e+00 : f32
    %66 = vector.broadcast %cst_31 : f32 to vector<8x32xf32>
    %67 = arith.addf %66, %65 : vector<8x32xf32>
    %68 = arith.mulf %62, %67 : vector<8x32xf32>
    %cst_32 = arith.constant dense<0.000000e+00> : vector<8xf32>
    %69 = vector.multi_reduction <add>, %68, %cst_32 [1] : vector<8x32xf32> to vector<8xf32>
    %70 = vector.shape_cast %69 : vector<8xf32> to vector<8x1xf32>
    %cst_33 = arith.constant 3.200000e+01 : f32
    %71 = vector.broadcast %cst_33 : f32 to vector<8x1xf32>
    %72 = arith.divf %70, %71 : vector<8x1xf32>
    %73 = vector.broadcast %72 : vector<8x1xf32> to vector<8x32xf32>
    %74 = arith.subf %68, %73 : vector<8x32xf32>
    %75 = arith.mulf %74, %74 : vector<8x32xf32>
    %cst_34 = arith.constant dense<0.000000e+00> : vector<8xf32>
    %76 = vector.multi_reduction <add>, %75, %cst_34 [1] : vector<8x32xf32> to vector<8xf32>
    %77 = vector.shape_cast %76 : vector<8xf32> to vector<8x1xf32>
    %cst_35 = arith.constant 3.200000e+01 : f32
    %78 = vector.broadcast %cst_35 : f32 to vector<8x1xf32>
    %79 = arith.divf %77, %78 : vector<8x1xf32>
    %cst_36 = arith.constant 9.99999974E-6 : f32
    %80 = vector.broadcast %cst_36 : f32 to vector<8x1xf32>
    %81 = arith.addf %79, %80 : vector<8x1xf32>
    %82 = math.rsqrt %81 : vector<8x1xf32>
    %83 = vector.broadcast %72 : vector<8x1xf32> to vector<8x32xf32>
    %84 = arith.subf %68, %83 : vector<8x32xf32>
    %85 = vector.broadcast %82 : vector<8x1xf32> to vector<8x32xf32>
    %86 = arith.mulf %84, %85 : vector<8x32xf32>
    %87 = vector.broadcast %3 : vector<1x32xf32> to vector<8x32xf32>
    %88 = arith.mulf %86, %87 : vector<8x32xf32>
    %89 = vector.broadcast %4 : vector<1x32xf32> to vector<8x32xf32>
    %90 = arith.addf %88, %89 : vector<8x32xf32>
    %c0_37 = arith.constant 0 : index
    %c0_38 = arith.constant 0 : index
    %91 = vector.load %arg10[%c0_37, %c0_38] : memref<32x16xf32, #tpu.memory_space<vmem>>, vector<32x16xf32>
    %cst_39 = arith.constant dense<0.000000e+00> : vector<8x16xf32>
    %92 = tpu.matmul %90, %91, %cst_39 {dimension_numbers = #tpu.dot_dimension_numbers<[1], [0], [0], [1], [0, 0, 1, 1], [], []>} : vector<8x32xf32>, vector<32x16xf32>, vector<8x16xf32> -> vector<8x16xf32>
    %c0_40 = arith.constant 0 : index
    %c0_41 = arith.constant 0 : index
    %93 = vector.load %arg4[%c0_40, %c0_41] : memref<8x16xf32, #tpu.memory_space<vmem>>, vector<8x16xf32>
    %cst_42 = arith.constant 0.000000e+00 : f32
    %94 = vector.broadcast %cst_42 : f32 to vector<8x16xf32>
    %95 = arith.cmpf one, %93, %94 : vector<8x16xf32>
    %cst_43 = arith.constant -9.99999984E+17 : f32
    %96 = vector.broadcast %cst_43 : f32 to vector<8x16xf32>
    %97 = arith.select %95, %92, %96 : vector<8x16xi1>, vector<8x16xf32>
    %c0_44 = arith.constant 0 : index
    %c0_45 = arith.constant 0 : index
    %98 = vector.load %arg11[%c0_44, %c0_45] : memref<8x16xf32, #tpu.memory_space<vmem>>, vector<8x16xf32>
    tpu.vector_store %arg11[%c0_44, %c0_45], %97 {strides = array<i32>} : memref<8x16xf32, #tpu.memory_space<vmem>>, vector<8x16xf32>,
    return
  }
  func.func @transform_0(%arg0: i32) -> (i32, i32) {
    %c0_i32 = arith.constant 0 : i32
    %c0_i32_0 = arith.constant 0 : i32
    return %arg0, %c0_i32 : i32, i32
  }
  func.func @transform_1(%arg0: i32) -> (i32, i32) {
    %c0_i32 = arith.constant 0 : i32
    %c0_i32_0 = arith.constant 0 : i32
    return %arg0, %c0_i32 : i32, i32
  }
  func.func @transform_2(%arg0: i32) -> (i32, i32) {
    %c0_i32 = arith.constant 0 : i32
    %c0_i32_0 = arith.constant 0 : i32
    return %arg0, %c0_i32 : i32, i32
  }
  func.func @transform_3(%arg0: i32) -> (i32, i32) {
    %c0_i32 = arith.constant 0 : i32
    %c0_i32_0 = arith.constant 0 : i32
    return %arg0, %c0_i32 : i32, i32
  }
  func.func @transform_4(%arg0: i32) -> (i32, i32) {
    %c0_i32 = arith.constant 0 : i32
    %c0_i32_0 = arith.constant 0 : i32
    %c0_i32_1 = arith.constant 0 : i32
    return %c0_i32, %c0_i32_0 : i32, i32
  }
  func.func @transform_5(%arg0: i32) -> (i32, i32) {
    %c0_i32 = arith.constant 0 : i32
    %c0_i32_0 = arith.constant 0 : i32
    %c0_i32_1 = arith.constant 0 : i32
    return %c0_i32, %c0_i32_0 : i32, i32
  }
  func.func @transform_6(%arg0: i32) -> (i32, i32) {
    %c0_i32 = arith.constant 0 : i32
    %c0_i32_0 = arith.constant 0 : i32
    %c0_i32_1 = arith.constant 0 : i32
    return %c0_i32, %c0_i32_0 : i32, i32
  }
  func.func @transform_7(%arg0: i32) -> (i32, i32) {
    %c0_i32 = arith.constant 0 : i32
    %c0_i32_0 = arith.constant 0 : i32
    %c0_i32_1 = arith.constant 0 : i32
    return %c0_i32, %c0_i32_0 : i32, i32
  }
  func.func @transform_8(%arg0: i32) -> (i32, i32) {
    %c0_i32 = arith.constant 0 : i32
    %c0_i32_0 = arith.constant 0 : i32
    %c0_i32_1 = arith.constant 0 : i32
    return %c0_i32, %c0_i32_0 : i32, i32
  }
  func.func @transform_9(%arg0: i32) -> (i32, i32) {
    %c0_i32 = arith.constant 0 : i32
    %c0_i32_0 = arith.constant 0 : i32
    %c0_i32_1 = arith.constant 0 : i32
    return %c0_i32, %c0_i32_0 : i32, i32
  }
  func.func @transform_10(%arg0: i32) -> (i32, i32) {
    %c0_i32 = arith.constant 0 : i32
    %c0_i32_0 = arith.constant 0 : i32
    return %arg0, %c0_i32 : i32, i32
  }
}

</mosaic_0001>

<bundles_post_ra>
// kernel: tpu_custom_call.1
= control target key start
LH: loop header
LB: loop body
LE: loop exit
PB: predicated region body
PF: predicated region fallthrough
CT: control target
= control target key end

     0   :  { %15 = vsyncpa [#allocation3], 0  ;;  %s978_s0 = inlined_call_operand.hbm [shape: f32[8,32], index: 0, kind: input, shape index: {}]   ;;  %s979_s1 = inlined_call_operand.vmem [shape: s32[8,1], index: 1, kind: input, shape index: {}]   ;;  %s980_s2 = inlined_call_operand.vmem [shape: s32[8,1], index: 2, kind: input, shape index: {}]   ;;  %s981_s3 = inlined_call_operand.hbm [shape: f32[8,16], index: 3, kind: input, shape index: {}]   ;;  %s982_s4 = inlined_call_operand.vmem [shape: f32[32,32], index: 4, kind: input, shape index: {}]   ;;  %s983_s5 = inlined_call_operand.hbm [shape: f32[16,32], index: 5, kind: input, shape index: {}]   ;;  %s984_s6 = inlined_call_operand.hbm [shape: f32[10,32], index: 6, kind: input, shape index: {}]   ;;  %s985_s7 = inlined_call_operand.vmem [shape: f32[32,32], index: 7, kind: input, shape index: {}]   ;;  %s986_s8 = inlined_call_operand.hbm [shape: f32[4,32], index: 8, kind: input, shape index: {}]   ;;  %s987_s9 = inlined_call_operand.vmem [shape: f32[32,16], index: 9, kind: input, shape index: {}]   ;;  %s988_s10 = inlined_call_operand.hbm [shape: f32[8,16], index: 10, kind: output, shape index: {}]  }
   0x1   :  { %16 = vsyncpa [#allocation6], 0 }
   0x2   :  { %17 = vsyncpa [#allocation9], 0 }
   0x3   :  { %18 = vsyncpa [#allocation4], 0  ;;  %s815_s13 = smov [#allocation5]  }
   0x4   :  { %s39_s14 = sshll.u32 %s815_s13, 4  ;;  %s40_s14 = int_to_ptr.vmem [resolvable:$true] %s39_s14 }
   0x5   :  { %s695_s15 = scalar_lea.vmem %s40_s14, 128  ;;  %p700_p1 = scmp.lt.s32.totalorder %s40_s14, %s40_s14 }
   0x6   :  { %p696_p0 = scmp.ne.s32.totalorder %s40_s14, %s695_s15  ;;  %p701_p2 = scmp.lt.s32.totalorder %s695_s15, %s695_s15 }
   0x8   :  { %p702_p3 = por %p701_p2, %p700_p1 }
   0xa   :  { %p703_p4 = pnand %p702_p3, %p696_p0 }
   0xc   :  { %706 = shalt.err (!%p703_p4)
}
   0xd   :  { %42 = dma.hbm_to_vmem [thread:$0]  %s981_s3, 128, %s40_s14, [#allocation6]  }
   0xe   :  { %s816_s18 = smov [#allocation8]   ;;  %s817_s20 = smov [#allocation2]  }
   0xf   :  { %s62_s19 = sshll.u32 %s816_s18, 4  ;;  %s25_s21 = sshll.u32 %s817_s20, 4  ;;  %s63_s19 = int_to_ptr.vmem [resolvable:$true] %s62_s19  ;;  %s26_s21 = int_to_ptr.vmem [resolvable:$true] %s25_s21 }
  0x10   :  { %s715_s22 = scalar_lea.vmem %s63_s19, 256  ;;  %p720_p6 = scmp.lt.s32.totalorder %s63_s19, %s63_s19 }
  0x11   :  { %p716_p5 = scmp.ne.s32.totalorder %s63_s19, %s715_s22  ;;  %p721_p7 = scmp.lt.s32.totalorder %s715_s22, %s715_s22 }
  0x13   :  { %p722_p8 = por %p721_p7, %p720_p6 }
  0x15   :  { %p723_p9 = pnand %p722_p8, %p716_p5 }
  0x17   :  { %726 = shalt.err (!%p723_p9)
}
  0x18   :  { %s818_s23 = smov 128   ;;  %s819_s24 = smov 8  }
  0x19   :  { %68 = dma.hbm_to_vmem [thread:$0]  %s984_s6, 256, %s63_s19, [#allocation9], %s818_s23, %s818_s23, %s819_s24  }
  0x1a   :  { %s735_s3 = scalar_lea.vmem %s26_s21, 128  ;;  %p740_p11 = scmp.lt.s32.totalorder %s26_s21, %s26_s21 }
  0x1b   :  { %p736_p10 = scmp.ne.s32.totalorder %s26_s21, %s735_s3  ;;  %p741_p12 = scmp.lt.s32.totalorder %s735_s3, %s735_s3 }
  0x1d   :  { %p742_p13 = por %p741_p12, %p740_p11 }
  0x1f   :  { %p743_p0 = pnand %p742_p13, %p736_p10 }
  0x21   :  { %746 = shalt.err (!%p743_p0)
}
  0x22   :  { %28 = dma.hbm_to_vmem [thread:$0]  %s978_s0, 128, %s26_s21, [#allocation3]  }
  0x23   :  { %s820_s29 = smov [#allocation7]   ;;  %s821_s11 = smov [#allocation10]  }
  0x24   :  { %s50_s30 = sshll.u32 %s820_s29, 4  ;;  %s77_s12 = sshll.u32 %s821_s11, 4  ;;  %s51_s30 = int_to_ptr.vmem [resolvable:$true] %s50_s30  ;;  %s78_s12 = int_to_ptr.vmem [resolvable:$true] %s77_s12 }
  0x25   :  { %s755_s13 = scalar_lea.vmem %s51_s30, 256  ;;  %p760_p2 = scmp.lt.s32.totalorder %s51_s30, %s51_s30 }
  0x26   :  { %p756_p1 = scmp.ne.s32.totalorder %s51_s30, %s755_s13  ;;  %p761_p3 = scmp.lt.s32.totalorder %s755_s13, %s755_s13 }
  0x28   :  { %p762_p4 = por %p761_p3, %p760_p2 }
  0x2a   :  { %p763_p5 = pnand %p762_p4, %p756_p1 }
  0x2c   :  { %766 = shalt.err (!%p763_p5)
}
  0x2d   :  { %56 = dma.hbm_to_vmem [thread:$0]  %s983_s5, 256, %s51_s30, [#allocation6], %s818_s23, %s818_s23, %s819_s24  }
  0x2e   :  { %s775_s15 = scalar_lea.vmem %s78_s12, 64  ;;  %p780_p7 = scmp.lt.s32.totalorder %s78_s12, %s78_s12 }
  0x2f   :  { %p776_p6 = scmp.ne.s32.totalorder %s78_s12, %s775_s15  ;;  %p781_p8 = scmp.lt.s32.totalorder %s775_s15, %s775_s15 }
  0x31   :  { %p782_p9 = por %p781_p8, %p780_p7 }
  0x33   :  { %p783_p10 = pnand %p782_p9, %p776_p6 }
  0x35   :  { %786 = shalt.err (!%p783_p10)
}
  0x36   :  { %80 = dma.hbm_to_vmem [thread:$0]  %s986_s8, 64, %s78_s12, [#allocation9]  }
  0x37   :  { %807 = dma.done.wait [#allocation3], 128  }
  0x38   :  { %808 = vsyncadd [#allocation3], 4294967168 }
  0x39   :  { %809 = dma.done.wait [#allocation6], 384  }
  0x3a   :  { %810 = vsyncadd [#allocation6], 4294966912 }
  0x3b   :  { %811 = dma.done.wait [#allocation9], 320  }
  0x3c   :  { %812 = vsyncadd [#allocation9], 4294966976  ;;  %v822_v0 = vmov 0   ;;  %v823_v1 = vmov 0.0   ;;  %vm824_vm0 = vmmov 0   ;;  %v103_v2 = vld [vmem:[%s979_s1] sm:$0xff]  ;;  %v104_v11 = vlaneseq }
  0x3d   :  { %678 = vset.pattern.permute.xlu0 %v822_v0  ;;  %627 = vmatprep.subr.mxu1 %v823_v1  ;;  %v122_v3 = vld [vmem:[%s982_s4 + $0x18] sm:$0xff]  ;;  %v121_v4 = vld [vmem:[%s982_s4 + $0x10] sm:$0xff]  ;;  %v112_v6 = vld [vmem:[%s980_s2] sm:$0xff]  ;;  %vm199_vm1 = vcmask 261120   ;;  %vm125_vm2 = vcmask 130048   ;;  %vm279_vm4 = vcmask 1041408  }
  0x3e   :  { %620 = vmatprep.subr.mxu0 %v823_v1  ;;  %624 = vmatprep.mubr.msk.f32.mxu0 %vm824_vm0, %v823_v1  ;;  %v124_v5 = vld [vmem:[#allocation7 + $0x8] sm:$0xff]  ;;  %v120_v7 = vld [vmem:[%s982_s4 + $0x8] sm:$0xff]  ;;  %v123_v8 = vld [vmem:[#allocation7] sm:$0xff]  ;;  %v105_v12 = vand.u32 127, %v104_v11  ;;  %vm275_vm5 = vcmask 80896   ;;  %s825_s16 = smov [#allocation11]  }
  0x3f   :  { %635 = vmatprep.mubr.msk.f32.mxu1 %vm824_vm0, %v823_v1  ;;  %107 = vperm.xlu0 %678, %v103_v2   ;;  %v119_v9 = vld [vmem:[%s982_s4] sm:$0xff]  ;;  %v274_v14 = vld [vmem:[#allocation8 + $0x8] sm:$0x3]  ;;  %v593_v24 = vld [vmem:[#allocation10] ss:$0 sm:$0xff]  ;;  %s576_s5 = sshll.u32 %s825_s16, 4  ;;  %s577_s5 = int_to_ptr.vmem [resolvable:$true] %s576_s5 }
  0x40   :  { %628 = vmatpush3.msra.mxu1 %v122_v3  ;;  %621 = vmatpush3.msra.mxu0 %v124_v5  ;;  %v98_v10 = vld [vmem:[#allocation2] sm:$0xff]  ;;  %v391_v40 = vld [vmem:[%s985_s7 + $0x18] sm:$0xff]  ;;  %v390_v41 = vld [vmem:[%s985_s7 + $0x10] sm:$0xff]  ;;  %p792_p12 = scmp.lt.s32.totalorder %s577_s5, %s577_s5 }
  0x41   :  { %629 = vmatprep.subr.mxu1 %v823_v1  ;;  %622 = vmatprep.subr.mxu0 %v823_v1  ;;  %v273_v16 = vld [vmem:[#allocation8] sm:$0xff]  ;;  %v389_v42 = vld [vmem:[%s985_s7 + $0x8] sm:$0xff]  ;;  %v594_v48 = vld [vmem:[#allocation10 + $0x2] ss:$0 sm:$0xff] }
  0x42   :  { %630 = vmatpush3.msra.mxu1 %v121_v4  ;;  %623 = vmatpush3.msra.mxu0 %v123_v8  ;;  %v388_v43 = vld [vmem:[%s985_s7] sm:$0xff]  ;;  %v595_v50 = vld [vmem:[#allocation10 + $0x3] ss:$0 sm:$0xff]  ;;  %v596_v53 = vld [vmem:[#allocation10 + $0x1] ss:$0 sm:$0xff] }
  0x43   :  { %631 = vmatprep.subr.mxu1 %v823_v1  ;;  %114 = vperm.xlu0 %678, %v112_v6   ;;  %v492_v5 = vld [vmem:[%s987_s9 + $0x18] sm:$0xff]  ;;  %v491_v6 = vld [vmem:[%s987_s9 + $0x10] sm:$0xff]  ;;  %v489_v8 = vld [vmem:[%s987_s9] sm:$0xff] }
  0x44   :  { %632 = vmatpush3.msra.mxu1 %v120_v7  ;;  %638 = vmatprep.subr.mxu0 %v823_v1  ;;  %v490_v7 = vld [vmem:[%s987_s9 + $0x8] sm:$0xff]  ;;  %s787_s9 = scalar_lea.vmem %s577_s5, 128 }
  0x45   :  { %633 = vmatprep.subr.mxu1 %v823_v1  ;;  %p788_p11 = scmp.ne.s32.totalorder %s577_s5, %s787_s9  ;;  %p793_p13 = scmp.lt.s32.totalorder %s787_s9, %s787_s9 }
  0x46   :  { %634 = vmatpush3.msra.mxu1 %v119_v9 }
  0x47   :  { %636 = vmatmul.mubr.msk.f32.vlgmr.msra.gmra.mxu1 %vm199_vm1, %v98_v10  ;;  %656 = vmatprep.subr.mxu1 %v823_v1  ;;  %p794_p0 = por %p793_p13, %p792_p12 }
  0x48   :  { %664 = vmatprep.mubr.msk.f32.mxu1 %vm824_vm0, %v823_v1  ;;  %657 = vmatpush3.msra.mxu1 %v492_v5 }
  0x49   :  { %658 = vmatprep.subr.mxu1 %v823_v1  ;;  %p795_p1 = pnand %p794_p0, %p788_p11 }
  0x4a   :  { %659 = vmatpush3.msra.mxu1 %v491_v6 }
  0x4b   :  { %660 = vmatprep.subr.mxu1 %v823_v1 }
  0x4c   :  { %661 = vmatpush3.msra.mxu1 %v490_v7 }
  0x4d   :  { %662 = vmatprep.subr.mxu1 %v823_v1 }
  0x4e   :  { %663 = vmatpush3.msra.mxu1 %v489_v8 }
  0xba   :  { %v108_v13 = vpop.permute.xlu0 %107 }
  0xbb   :  { %vm109_vm3 = vcmp.eq.s32.totalorder %v108_v13, %v105_v12 }
  0xbc   :  { %v587_v15 = vsel %vm109_vm3, 1.0, %v823_v1 }
  0xbd   :  { %625 = vmatmul.mubr.msk.f32.vlgmr.msra.gmra.mxu0 %vm125_vm2, %v587_v15 }
  0xbe   :  { %639 = vmatpush3.msk.msra.mxu0 %vm279_vm4, %v274_v14  ;;  %v115_v17 = vpop.permute.xlu0 %114  ;;  %642 = vmatprep.mubr.msk.f32.mxu0 %vm824_vm0, %v823_v1 }
  0xbf   :  { %640 = vmatprep.subr.mxu0 %v823_v1  ;;  %vm116_vm6 = vcmp.eq.s32.totalorder %v115_v17, %v105_v12 }
  0xc0   :  { %v588_v18 = vsel %vm116_vm6, 1.0, %v823_v1  ;;  %641 = vmatpush3.msra.mxu0 %v273_v16  ;;  %v566_v16 = vld [vmem:[#allocation5] sm:$0xff] }
  0xc1   :  { %643 = vmatmul.mubr.msk.f32.vlgmr.msra.gmra.mxu0 %vm275_vm5, %v588_v18  ;;  %645 = vmatprep.subr.mxu0 %v823_v1  ;;  %vm567_vm7 = vcmp.ne.f32.partialorder %v566_v16, 0.0 }
  0xc2   :  { %653 = vmatprep.mubr.msk.f32.mxu0 %vm824_vm0, %v823_v1  ;;  %646 = vmatpush3.msra.mxu0 %v391_v40 }
  0xc3   :  { %647 = vmatprep.subr.mxu0 %v823_v1 }
  0xc4   :  { %648 = vmatpush3.msra.mxu0 %v390_v41 }
  0xc5   :  { %649 = vmatprep.subr.mxu0 %v823_v1 }
  0xc6   :  { %650 = vmatpush3.msra.mxu0 %v389_v42 }
  0xc7   :  { %651 = vmatprep.subr.mxu0 %v823_v1 }
  0xc8   :  { %652 = vmatpush3.msra.mxu0 %v388_v43 }
 0x107   :  { %v269_v19 = vpop.f32.mrf.mxu1 }
 0x109   :  { %v637_v20 = vpop.f32.mrf.mxu1 }
 0x17d   :  { %v195_v21 = vpop.f32.mrf.mxu0 }
 0x17e   :  { %v270_v23 = vadd.f32 %v269_v19, %v195_v21 }
 0x17f   :  { %v626_v22 = vpop.f32.mrf.mxu0 }
 0x181   :  { %v349_v25 = vpop.f32.mrf.mxu0 }
 0x182   :  { %v353_v26 = vadd.f32 %v349_v25, %v270_v23 }
 0x183   :  { %v644_v27 = vpop.f32.mrf.mxu0 }
 0x184   :  { %v358_v28 = vadd.f32 %v593_v24, %v353_v26 }
 0x186   :  { %v360_v29 = vmul.f32 0.70710677, %v358_v28  ;;  %v359_v31 = vmul.f32 0.5, %v358_v28 }
 0x188   :  { %679 = verf.f32 %v360_v29 }
 0x195   :  { %v680_v30 = vpop.eup %679 }
 0x196   :  { %v362_v32 = vadd.f32 1.0, %v680_v30 }
 0x198   :  { %v363_v33 = vmul.f32 %v362_v32, %v359_v31 }
 0x19a   :  { %v364_v34 = vsel %vm199_vm1, %v363_v33, 0.0 }
 0x19b   :  { %365 = vadd.xlane.f32.xlu1 %v364_v34 }
 0x224   :  { %v366_v35 = vpop.xlane.xlu1 %365 }
 0x225   :  { %v368_v36 = vmul.f32 0.03125, %v366_v35 }
 0x227   :  { %v369_v37 = vsub.f32 %v363_v33, %v368_v36 }
 0x229   :  { %v370_v38 = vmul.f32 %v369_v37, %v369_v37 }
 0x22b   :  { %v371_v39 = vsel %vm199_vm1, %v370_v38, 0.0 }
 0x22c   :  { %372 = vadd.xlane.f32.xlu1 %v371_v39 }
 0x2b5   :  { %v373_v44 = vpop.xlane.xlu1 %372 }
 0x2b6   :  { %v374_v45 = vmul.f32 0.03125, %v373_v44 }
 0x2b8   :  { %v375_v46 = vadd.f32 1e-05, %v374_v45 }
 0x2ba   :  { %681 = vrsqrt.f32 %v375_v46 }
 0x2c7   :  { %v682_v47 = vpop.eup %681 }
 0x2c8   :  { %v377_v49 = vmul.f32 %v682_v47, %v369_v37 }
 0x2ca   :  { %v382_v51 = vmul.f32 %v594_v48, %v377_v49 }
 0x2cc   :  { %v387_v52 = vadd.f32 %v595_v50, %v382_v51 }
 0x2ce   :  { %654 = vmatmul.mubr.msk.f32.vlgmr.msra.gmra.mxu0 %vm199_vm1, %v387_v52 }
 0x38e   :  { %v465_v54 = vpop.f32.mrf.mxu0 }
 0x38f   :  { %v466_v55 = vadd.f32 %v596_v53, %v465_v54 }
 0x390   :  { %v655_v56 = vpop.f32.mrf.mxu0 }
 0x391   :  { %v470_v57 = vmul.f32 0.70710677, %v466_v55  ;;  %v469_v59 = vmul.f32 0.5, %v466_v55 }
 0x393   :  { %683 = verf.f32 %v470_v57 }
 0x3a0   :  { %v684_v58 = vpop.eup %683 }
 0x3a1   :  { %v472_v60 = vadd.f32 1.0, %v684_v58 }
 0x3a3   :  { %v473_v61 = vmul.f32 %v472_v60, %v469_v59 }
 0x3a5   :  { %v474_v62 = vsel %vm199_vm1, %v473_v61, 0.0 }
 0x3a6   :  { %475 = vadd.xlane.f32.xlu0 %v474_v62 }
 0x42f   :  { %v476_v63 = vpop.xlane.xlu0 %475 }
 0x430   :  { %v477_v0 = vmul.f32 0.03125, %v476_v63 }
 0x432   :  { %v478_v2 = vsub.f32 %v473_v61, %v477_v0 }
 0x434   :  { %v479_v3 = vmul.f32 %v478_v2, %v478_v2 }
 0x436   :  { %v480_v4 = vsel %vm199_vm1, %v479_v3, 0.0 }
 0x437   :  { %481 = vadd.xlane.f32.xlu1 %v480_v4 }
 0x4c0   :  { %v482_v9 = vpop.xlane.xlu1 %481 }
 0x4c1   :  { %v483_v10 = vmul.f32 0.03125, %v482_v9 }
 0x4c3   :  { %v484_v11 = vadd.f32 1e-05, %v483_v10 }
 0x4c5   :  { %685 = vrsqrt.f32 %v484_v11 }
 0x4d2   :  { %v686_v12 = vpop.eup %685 }
 0x4d3   :  { %v486_v13 = vmul.f32 %v686_v12, %v478_v2 }
 0x4d5   :  { %v487_v14 = vmul.f32 %v594_v48, %v486_v13 }
 0x4d7   :  { %v488_v15 = vadd.f32 %v595_v50, %v487_v14 }
 0x4d9   :  { %665 = vmatmul.mubr.msk.f32.vlgmr.msra.gmra.mxu1 %vm199_vm1, %v488_v15 }
 0x599   :  { %v562_v17 = vpop.f32.mrf.mxu1 }
 0x59a   :  { %v568_v18 = vsel %vm567_vm7, %v562_v17, -1e+18 }
 0x59b   :  { %569 = vst.msk [vmem:[#allocation11] sm:$0xff] %vm125_vm2, %v568_v18  ;;  %v666_v1 = vpop.f32.mrf.mxu1 }
 0x59c   :  { %798 = shalt.err (!%p795_p1)
}
 0x59d   :  { %579 = dma.vmem_to_hbm [thread:$0]  %s577_s5, 128, %s988_s10, [#allocation4]  }
 0x59e   :  { %813 = dma.done.wait [#allocation4], 128  }
 0x59f   :  { %814 = vsyncadd [#allocation4], 4294967168 }
 0x5a0   :  { %583 = vsyncpa [#allocation3], 1 }
 0x5a1   :  { %584 = vsyncpa [#allocation6], 1 }
 0x5a2   :  { %585 = vsyncpa [#allocation9], 1 }
 0x5a3   :  { %586 = vsyncpa [#allocation4], 1 }

</bundles_post_ra>
